<compile_context>
chip_gen: v7x
topology: tpu7x:2x2x1
jax: 0.10.0
libtpu: 0.0.40
codegen_flags: <defaults>
</compile_context>

<pallas_src>
import functools

import jax
import jax.numpy as jnp
from jax.experimental import pallas as pl
from jax.experimental.pallas import tpu as pltpu

ALPHA = 1.0
GAMMA = 5          # integer power -> lowered as an explicit multiply chain
IGNORE_INDEX = -100


def _focal_loss_kernel(logits_ref, targets_ref, mixup_ref, partial_ref, *, n_rows):
    i = pl.program_id(0)

    x = logits_ref[...].astype(jnp.float32)       # (TN, C) upcast in VMEM only
    t = targets_ref[...]                          # (TN, 1) int32
    w = mixup_ref[...].astype(jnp.float32)        # (TN, 1)

    tn, c = x.shape

    # Numerically stable log-softmax pieces (reductions along the lane axis).
    m = jnp.max(x, axis=-1, keepdims=True)                       # (TN, 1)
    z = x - m                                                    # (TN, C)
    lse = jnp.log(jnp.sum(jnp.exp(z), axis=-1, keepdims=True))   # (TN, 1)

    # Fused gather of z[i, t[i]]: single VPU pass, no one-hot materialization.
    col = jax.lax.broadcasted_iota(jnp.int32, (tn, c), 1)
    z_t = jnp.sum(jnp.where(col == t, z, 0.0), axis=-1, keepdims=True)

    # Per-sample CE; ignored rows contribute exactly 0
    # (PyTorch CrossEntropyLoss(ignore_index, reduction='none') semantics).
    ce = jnp.where(t != IGNORE_INDEX, lse - z_t, 0.0)            # (TN, 1)

    # Focal modulation: alpha * (1 - pt)^gamma * ce, gamma=5 via multiply chain.
    pt = jnp.exp(-ce)
    p = 1.0 - pt
    p2 = p * p
    p4 = p2 * p2
    focal = (ALPHA * (p4 * p)) * ce * w

    # Mask rows past the true batch size (partial last tile reads padding;
    # jnp.where also stops any NaN from padded garbage from propagating).
    row = i * tn + jax.lax.broadcasted_iota(jnp.int32, (tn, 1), 0)
    focal = jnp.where(row < n_rows, focal, 0.0)

    # Lane-dense partial-sum row for this tile (unmasked vst; summed in wrapper).
    s = jnp.sum(focal)
    partial_ref[...] = jnp.full((1, 1, 128), s, dtype=jnp.float32)


def _choose_tile_n(n_rows, n_cols, itemsize):
    # Cap a logits tile at ~4 MiB so 2 inputs x 2 pipeline buffers stay well
    # inside scoped VMEM on every generation (v5e 16 MiB .. v7x 32 MiB default).
    budget_rows = (4 * 1024 * 1024) // max(1, n_cols * itemsize)
    budget_rows = max(8, (budget_rows // 8) * 8)
    tile = min(1024, budget_rows)
    if n_rows <= tile:
        return n_rows          # single block == full extent (always a legal block)
    return tile                # multiple of 8 -> legal sublane block size


def focal_loss(logits, targets, mixup=None, *, tile_n=None):
    """Focal loss: reduction='mean', alpha=1, gamma=5, ignore_index=-100.

    logits : (N, C) float array (passed through in its native dtype)
    targets: (N,)   int array of class indices (or -100 to ignore)
    mixup  : optional (N,) float array of per-sample weights
    """
    N, C = logits.shape
    targets2d = targets.astype(jnp.int32).reshape(N, 1)
    if mixup is None:
        mixup2d = jnp.ones((N, 1), dtype=jnp.float32)
    else:
        mixup2d = mixup.astype(jnp.float32).reshape(N, 1)

    itemsize = int(jnp.dtype(logits.dtype).itemsize)
    if tile_n is None:
        tile_n = _choose_tile_n(N, C, itemsize)
    num_tiles = pl.cdiv(N, tile_n)

    kernel = functools.partial(_focal_loss_kernel, n_rows=N)

    cost = pl.CostEstimate(
        flops=int(10 * N * C),
        transcendentals=int(N * C + 2 * N),          # exp over tiles, log/exp per row
        bytes_accessed=int(N * C * itemsize + 2 * N * 4 + num_tiles * 512),
    )

    partials = pl.pallas_call(
        kernel,
        out_shape=jax.ShapeDtypeStruct((num_tiles, 1, 128), jnp.float32),
        grid_spec=pltpu.PrefetchScalarGridSpec(
            num_scalar_prefetch=0,
            grid=(num_tiles,),
            in_specs=[
                pl.BlockSpec((tile_n, C), lambda i: (i, 0)),   # logits tile
                pl.BlockSpec((tile_n, 1), lambda i: (i, 0)),   # targets tile
                pl.BlockSpec((tile_n, 1), lambda i: (i, 0)),   # mixup tile
            ],
            out_specs=pl.BlockSpec((1, 1, 128), lambda i: (i, 0, 0)),
        ),
        compiler_params=pltpu.CompilerParams(
            dimension_semantics=("parallel",),       # independent partial sums
            vmem_limit_bytes=32 * 1024 * 1024,
        ),
        cost_estimate=cost,
    )(logits, targets2d, mixup2d)

    # reduction == 'mean': torch.mean over ALL N samples (including ignored).
    return jnp.sum(partials[:, 0, 0]) / jnp.float32(N)


def _reference_focal_loss(logits, targets, mixup=None):
    # Pure-JAX reference mirroring the PyTorch module, for sanity checking.
    logp = jax.nn.log_softmax(logits.astype(jnp.float32), axis=-1)
    valid = targets != IGNORE_INDEX
    safe_t = jnp.where(valid, targets, 0)
    ce = -jnp.take_along_axis(logp, safe_t[:, None], axis=-1)[:, 0]
    ce = jnp.where(valid, ce, 0.0)
    pt = jnp.exp(-ce)
    f = ALPHA * (1.0 - pt) ** GAMMA * ce
    if mixup is not None:
        f = f * mixup
    return jnp.mean(f)


if __name__ == "__main__":
    key = jax.random.PRNGKey(0)
    k1, k2, k3 = jax.random.split(key, 3)

    # Small shapes: batch of 8 samples, 32 classes.
    N, C = 8, 32
    logits = jax.random.normal(k1, (N, C), dtype=jnp.float32) * 2.0
    targets = jax.random.randint(k2, (N,), 0, C, dtype=jnp.int32)
    targets = targets.at[3].set(IGNORE_INDEX)   # exercise ignore_index handling
    mixup = jax.random.uniform(k3, (N,), dtype=jnp.float32)

    # f32 path with mixup.
    out = focal_loss(logits, targets, mixup)
    jax.block_until_ready(out)
    ref = _reference_focal_loss(logits, targets, mixup)
    assert jnp.allclose(out, ref, atol=1e-5, rtol=1e-5), (out, ref)

    # mixup=None path.
    out2 = focal_loss(logits, targets, None)
    jax.block_until_ready(out2)
    ref2 = _reference_focal_loss(logits, targets, None)
    assert jnp.allclose(out2, ref2, atol=1e-5, rtol=1e-5), (out2, ref2)

    # bf16 logits pass straight through (no wrapper upcast); ref on upcast values.
    logits_bf16 = logits.astype(jnp.bfloat16)
    out3 = focal_loss(logits_bf16, targets, mixup)
    jax.block_until_ready(out3)
    ref3 = _reference_focal_loss(logits_bf16.astype(jnp.float32), targets, mixup)
    assert jnp.allclose(out3, ref3, atol=1e-4, rtol=1e-4), (out3, ref3)

    # Multi-tile + partial last tile: force tile_n=8 with N=20 (grid of 3,
    # last tile only 4 valid rows -> exercises the row mask + parallel partials).
    N2, C2 = 20, 32
    k4, k5, k6 = jax.random.split(jax.random.PRNGKey(1), 3)
    logits2 = jax.random.normal(k4, (N2, C2), dtype=jnp.float32)
    targets2 = jax.random.randint(k5, (N2,), 0, C2, dtype=jnp.int32)
    targets2 = targets2.at[7].set(IGNORE_INDEX)
    mixup2 = jax.random.uniform(k6, (N2,), dtype=jnp.float32)
    out4 = focal_loss(logits2, targets2, mixup2, tile_n=8)
    jax.block_until_ready(out4)
    ref4 = _reference_focal_loss(logits2, targets2, mixup2)
    assert jnp.allclose(out4, ref4, atol=1e-5, rtol=1e-5), (out4, ref4)

    print("KERNEL_OK")
</pallas_src>

<mosaic_0001>
module attributes {stable_mosaic.version = 11 : i64} {
  func.func @_focal_loss_kernel(%arg0: i32, %arg1: memref<8x32xf32, #tpu.memory_space<vmem>>, %arg2: memref<8x1xi32, #tpu.memory_space<vmem>>, %arg3: memref<8x1xf32, #tpu.memory_space<vmem>>, %arg4: memref<1x1x128xf32, #tpu.memory_space<vmem>>) attributes {dimension_semantics = [#tpu.dimension_semantics<parallel>], iteration_bounds = array<i64: 1>, scalar_prefetch = 0 : i64, scratch_operands = 0 : i64, tpu.core_type = #tpu.core_type<tc>, window_params = [{transform_indices = @transform_0, window_bounds = array<i64: 8, 32>}, {transform_indices = @transform_1, window_bounds = array<i64: 8, 1>}, {transform_indices = @transform_2, window_bounds = array<i64: 8, 1>}, {transform_indices = @transform_3, window_bounds = array<i64: 1, 1, 128>}]} {
    %c0 = arith.constant 0 : index
    %c0_0 = arith.constant 0 : index
    %0 = vector.load %arg1[%c0, %c0_0] : memref<8x32xf32, #tpu.memory_space<vmem>>, vector<8x32xf32>
    %c0_1 = arith.constant 0 : index
    %c0_2 = arith.constant 0 : index
    %1 = vector.load %arg2[%c0_1, %c0_2] : memref<8x1xi32, #tpu.memory_space<vmem>>, vector<8x1xi32>
    %c0_3 = arith.constant 0 : index
    %c0_4 = arith.constant 0 : index
    %2 = vector.load %arg3[%c0_3, %c0_4] : memref<8x1xf32, #tpu.memory_space<vmem>>, vector<8x1xf32>
    %cst = arith.constant dense<0xFF800000> : vector<8xf32>
    %3 = vector.multi_reduction <maximumf>, %0, %cst [1] : vector<8x32xf32> to vector<8xf32>
    %4 = vector.shape_cast %3 : vector<8xf32> to vector<8x1xf32>
    %5 = vector.broadcast %4 : vector<8x1xf32> to vector<8x32xf32>
    %6 = arith.subf %0, %5 : vector<8x32xf32>
    %7 = math.exp %6 : vector<8x32xf32>
    %cst_5 = arith.constant dense<0.000000e+00> : vector<8xf32>
    %8 = vector.multi_reduction <add>, %7, %cst_5 [1] : vector<8x32xf32> to vector<8xf32>
    %9 = vector.shape_cast %8 : vector<8xf32> to vector<8x1xf32>
    %10 = math.log %9 : vector<8x1xf32>
    %11 = tpu.iota {dimensions = array<i32: 1>} : vector<8x32xi32>
    %12 = vector.broadcast %1 : vector<8x1xi32> to vector<8x32xi32>
    %13 = arith.cmpi eq, %11, %12 : vector<8x32xi32>
    %cst_6 = arith.constant 0.000000e+00 : f32
    %14 = vector.broadcast %cst_6 : f32 to vector<8x32xf32>
    %15 = arith.select %13, %6, %14 : vector<8x32xi1>, vector<8x32xf32>
    %cst_7 = arith.constant dense<0.000000e+00> : vector<8xf32>
    %16 = vector.multi_reduction <add>, %15, %cst_7 [1] : vector<8x32xf32> to vector<8xf32>
    %17 = vector.shape_cast %16 : vector<8xf32> to vector<8x1xf32>
    %c-100_i32 = arith.constant -100 : i32
    %18 = vector.broadcast %c-100_i32 : i32 to vector<8x1xi32>
    %19 = arith.cmpi ne, %1, %18 : vector<8x1xi32>
    %20 = arith.subf %10, %17 : vector<8x1xf32>
    %cst_8 = arith.constant 0.000000e+00 : f32
    %21 = vector.broadcast %cst_8 : f32 to vector<8x1xf32>
    %22 = arith.select %19, %20, %21 : vector<8x1xi1>, vector<8x1xf32>
    %cst_9 = arith.constant 0.000000e+00 : f32
    %23 = vector.broadcast %cst_9 : f32 to vector<8x1xf32>
    %24 = arith.subf %23, %22 : vector<8x1xf32>
    %25 = math.exp %24 : vector<8x1xf32>
    %cst_10 = arith.constant 1.000000e+00 : f32
    %26 = vector.broadcast %cst_10 : f32 to vector<8x1xf32>
    %27 = arith.subf %26, %25 : vector<8x1xf32>
    %28 = arith.mulf %27, %27 : vector<8x1xf32>
    %29 = arith.mulf %28, %28 : vector<8x1xf32>
    %30 = arith.mulf %29, %27 : vector<8x1xf32>
    %cst_11 = arith.constant 1.000000e+00 : f32
    %31 = vector.broadcast %cst_11 : f32 to vector<8x1xf32>
    %32 = arith.mulf %31, %30 : vector<8x1xf32>
    %33 = arith.mulf %32, %22 : vector<8x1xf32>
    %34 = arith.mulf %33, %2 : vector<8x1xf32>
    %c8_i32 = arith.constant 8 : i32
    %35 = arith.muli %arg0, %c8_i32 : i32
    %36 = tpu.iota {dimensions = array<i32: 0>} : vector<8x1xi32>
    %37 = vector.broadcast %35 : i32 to vector<8x1xi32>
    %38 = arith.addi %37, %36 : vector<8x1xi32>
    %c8_i32_12 = arith.constant 8 : i32
    %39 = vector.broadcast %c8_i32_12 : i32 to vector<8x1xi32>
    %40 = arith.cmpi slt, %38, %39 : vector<8x1xi32>
    %cst_13 = arith.constant 0.000000e+00 : f32
    %41 = vector.broadcast %cst_13 : f32 to vector<8x1xf32>
    %42 = arith.select %40, %34, %41 : vector<8x1xi1>, vector<8x1xf32>
    %43 = vector.shape_cast %42 : vector<8x1xf32> to vector<1x8x1xf32>
    %cst_14 = arith.constant dense<0.000000e+00> : vector<1xf32>
    %44 = vector.multi_reduction <add>, %43, %cst_14 [1, 2] : vector<1x8x1xf32> to vector<1xf32>
    %45 = vector.shape_cast %44 : vector<1xf32> to vector<1x1x1xf32>
    %46 = vector.extract %45[0, 0, 0] : f32 from vector<1x1x1xf32>
    %47 = vector.broadcast %46 : f32 to vector<1x1x128xf32>
    %c0_15 = arith.constant 0 : index
    %c0_16 = arith.constant 0 : index
    %c0_17 = arith.constant 0 : index
    %48 = vector.load %arg4[%c0_15, %c0_16, %c0_17] : memref<1x1x128xf32, #tpu.memory_space<vmem>>, vector<1x1x128xf32>
    tpu.vector_store %arg4[%c0_15, %c0_16, %c0_17], %47 {strides = array<i32>} : memref<1x1x128xf32, #tpu.memory_space<vmem>>, vector<1x1x128xf32>,
    return
  }
  func.func @transform_0(%arg0: i32) -> (i32, i32) {
    %c0_i32 = arith.constant 0 : i32
    %c0_i32_0 = arith.constant 0 : i32
    return %arg0, %c0_i32 : i32, i32
  }
  func.func @transform_1(%arg0: i32) -> (i32, i32) {
    %c0_i32 = arith.constant 0 : i32
    %c0_i32_0 = arith.constant 0 : i32
    return %arg0, %c0_i32 : i32, i32
  }
  func.func @transform_2(%arg0: i32) -> (i32, i32) {
    %c0_i32 = arith.constant 0 : i32
    %c0_i32_0 = arith.constant 0 : i32
    return %arg0, %c0_i32 : i32, i32
  }
  func.func @transform_3(%arg0: i32) -> (i32, i32, i32) {
    %c0_i32 = arith.constant 0 : i32
    %c0_i32_0 = arith.constant 0 : i32
    %c0_i32_1 = arith.constant 0 : i32
    return %arg0, %c0_i32, %c0_i32_0 : i32, i32, i32
  }
}

</mosaic_0001>

<bundles_post_ra>
// kernel: tpu_custom_call.1
= control target key start
LH: loop header
LB: loop body
LE: loop exit
PB: predicated region body
PF: predicated region fallthrough
CT: control target
= control target key end

     0   :  { %vm18_vm0 = vcmask 261120   ;;  %s167_s0 = inlined_call_operand.vmem [shape: f32[8,32], index: 0, kind: input, shape index: {}]   ;;  %s168_s1 = inlined_call_operand.vmem [shape: s32[8,1], index: 1, kind: input, shape index: {}]   ;;  %s169_s2 = inlined_call_operand.vmem [shape: f32[8,1], index: 2, kind: input, shape index: {}]   ;;  %s170_s3 = inlined_call_operand.hbm [shape: f32[1,1,128], index: 3, kind: output, shape index: {}]  }
   0x1   :  { %v15_v0 = vld [vmem:[%s167_s0] sm:$0xff] }
   0x2   :  { %8 = vsyncpa [#allocation3], 0  ;;  %v19_v1 = vsel %vm18_vm0, %v15_v0, -inf  ;;  %v121_v2 = vmov 0   ;;  %v16_v3 = vld [vmem:[%s168_s1] sm:$0xff]  ;;  %v30_v7 = vlaneseq  ;;  %vm59_vm3 = vcmask 7168  }
   0x3   :  { %90 = vset.pattern.permute.xlu0 %v121_v2  ;;  %vm40_vm2 = vcmp.ne.s32.totalorder %v16_v3, 4294967196  ;;  %v17_v27 = vld [vmem:[%s169_s2] sm:$0xff]  ;;  %s122_s16 = smov [#allocation2]  }
   0x4   :  { %20 = vmax.xlane.f32.xlu0 %v19_v1  ;;  %v31_v8 = vand.u32 127, %v30_v7  ;;  %s78_s17 = sshll.u32 %s122_s16, 4  ;;  %s79_s17 = int_to_ptr.vmem [resolvable:$true] %s78_s17 }
   0x5   :  { %s97_s2 = scalar_lea.vmem %s79_s17, 16  ;;  %s101_s19 = scalar_lea.vmem %s79_s17, 32 }
   0x6   :  { %p98_p0 = scmp.ne.s32.totalorder %s79_s17, %s97_s2  ;;  %p102_p1 = scmp.lt.s32.totalorder %s79_s17, %s79_s17 }
   0x7   :  { %p103_p2 = scmp.lt.s32.totalorder %s101_s19, %s97_s2 }
   0x9   :  { %p104_p3 = por %p103_p2, %p102_p1 }
   0xb   :  { %p105_p4 = pnand %p104_p3, %p98_p0 }
  0x1a   :  { %33 = vperm.xlu0 %90, %v16_v3  }
  0x91   :  { %v21_v4 = vpop.xlane.xlu0 %20 }
  0x92   :  { %v22_v5 = vsub.f32 %v15_v0, %v21_v4 }
  0x94   :  { %v23_v6 = vmul.f32 1.442695, %v22_v5 }
  0x96   :  { %91 = vpow2.f32 %v23_v6 }
  0x99   :  { %v34_v9 = vpop.permute.xlu0 %33 }
  0x9a   :  { %vm35_vm1 = vcmp.eq.s32.totalorder %v31_v8, %v34_v9 }
  0x9b   :  { %v36_v12 = vsel %vm35_vm1, %v22_v5, 0.0 }
  0x9c   :  { %v37_v13 = vsel %vm18_vm0, %v36_v12, 0.0 }
  0xa0   :  { %v92_v10 = vpop.eup %91 }
  0xa1   :  { %v25_v11 = vsel %vm18_vm0, %v92_v10, 0.0 }
  0xa2   :  { %26 = vadd.xlane.f32.xlu1 %v25_v11 }
  0xa6   :  { %38 = vadd.xlane.f32.xlu1 %v37_v13 }
 0x12f   :  { %v27_v14 = vpop.xlane.xlu1 %26 }
 0x130   :  { %93 = vlog2.f32 %v27_v14 }
 0x133   :  { %v39_v17 = vpop.xlane.xlu1 %38 }
 0x13a   :  { %v94_v15 = vpop.eup %93 }
 0x13b   :  { %v29_v16 = vmul.f32 0.6931472, %v94_v15 }
 0x13d   :  { %v41_v18 = vsub.f32 %v29_v16, %v39_v17 }
 0x13f   :  { %v42_v19 = vsel %vm40_vm2, %v41_v18, 0.0 }
 0x140   :  { %v43_v20 = vsub.f32 0.0, %v42_v19 }
 0x142   :  { %v44_v21 = vmul.f32 1.442695, %v43_v20 }
 0x144   :  { %95 = vpow2.f32 %v44_v21 }
 0x14e   :  { %v96_v22 = vpop.eup %95 }
 0x14f   :  { %v46_v23 = vsub.f32 1.0, %v96_v22 }
 0x151   :  { %v47_v24 = vmul.f32 %v46_v23, %v46_v23 }
 0x153   :  { %v48_v25 = vmul.f32 %v47_v24, %v47_v24 }
 0x155   :  { %v49_v26 = vmul.f32 %v48_v25, %v46_v23 }
 0x157   :  { %v50_v28 = vmul.f32 %v49_v26, %v42_v19 }
 0x159   :  { %v51_v29 = vmul.f32 %v50_v28, %v17_v27 }
 0x15b   :  { %v60_v30 = vsel %vm59_vm3, %v51_v29, 0.0 }
 0x15c   :  { %61 = vadd.xlane.f32.xlu1 %v60_v30 }
 0x1e9   :  { %v62_v31 = vpop.xlane.xlu1 %61 }
 0x1ea   :  { %v63_v32 = vrot.slane %v62_v31, 4 }
 0x1ec   :  { %v64_v33 = vadd.f32 %v63_v32, %v62_v31 }
 0x1ee   :  { %v65_v34 = vrot.slane %v64_v33, 2 }
 0x1f0   :  { %v66_v35 = vadd.f32 %v65_v34, %v64_v33 }
 0x1f2   :  { %v67_v36 = vrot.slane %v66_v35, 1 }
 0x1f4   :  { %v68_v37 = vadd.f32 %v67_v36, %v66_v35 }
 0x1f6   :  { %86 = vpush %v68_v37 }
 0x227   :  { %s87_s18 = spop %86 }
 0x228   :  { %v70_v38 = vstv %s87_s18 }
 0x229   :  { %71 = vst [vmem:[#allocation2] sm:$0x1] %v70_v38 }
 0x22a   :  { %108 = shalt.err (!%p105_p4)
}
 0x22b   :  { %s109_s22 = scalar_lea.hbm %s170_s3, 16 }
 0x22c   :  { %p110_p5 = scmp.ne.s32.totalorder %s170_s3, %s109_s22  ;;  %p113_p6 = scmp.lt.u32.totalorder %s109_s22, %s170_s3 }
 0x22e   :  { %p115_p7 = pnand %p113_p6, %p110_p5 }
 0x230   :  { %118 = shalt.err (!%p115_p7)
}
 0x231   :  { %81 = dma.vmem_to_hbm [thread:$0]  %s79_s17, 16, %s170_s3, [#allocation3]  }
 0x232   :  { %119 = dma.done.wait [#allocation3], 16  }
 0x233   :  { %120 = vsyncadd [#allocation3], 4294967280 }
 0x234   :  { %85 = vsyncpa [#allocation3], 1 }

</bundles_post_ra>
